<compile_context>
chip_gen: v7x
topology: tpu7x:2x2x1
jax: 0.10.0
libtpu: 0.0.40
codegen_flags: <defaults>
</compile_context>

<pallas_src>
import jax
import jax.numpy as jnp
from jax.experimental import pallas as pl
from jax.experimental.pallas import tpu as pltpu

LANE = 128  # TPU lane width


def _round_up(n, m):
    return ((n + m - 1) // m) * m


def _cdiv(a, b):
    return -(-a // b)


def policy_kernel(x_ref, w1_ref, b1_ref, w2_ref, b2_ref, out_ref):
    # x_ref:  (tb, obs)        w1_ref: (obs, inner_p)    b1_ref: (1, inner_p)
    # w2_ref: (inner_p, act_p) b2_ref: (1, act_p)        out_ref: (tb, act)
    act = out_ref.shape[-1]
    x = x_ref[...]
    h = jnp.dot(x, w1_ref[...], preferred_element_type=jnp.float32) + b1_ref[...]
    h = jnp.maximum(h, 0.0)                                        # ReLU (f32)
    y = jnp.dot(h.astype(w2_ref.dtype), w2_ref[...],
                preferred_element_type=jnp.float32) + b2_ref[...]
    y = jnp.clip(y, -1000.0, 1000.0)
    # Drop the zero-padded output lanes before the store -> only act (=4)
    # columns per row ever go back to HBM.
    out_ref[...] = y[:, :act].astype(out_ref.dtype)


def prepare_params(w1, b1, w2, b2, *, param_dtype=jnp.float32):
    """Pad the lane-mapped weight axes (inner, act) to 128 ONCE, outside the
    per-call path.  Padding is exact: extra hidden units see zero weight and
    zero bias (relu(0)=0); extra output columns are zero and are sliced off
    inside the kernel before the store, so they never reach HBM.

    Weights are stored as [in_features, out_features] (transposed vs. PyTorch).
    Biases stay f32 even in bf16 mode (accumulation / elementwise stay f32).
    """
    obs, inner = w1.shape
    act = w2.shape[1]
    inner_p = _round_up(inner, LANE)
    act_p = _round_up(act, LANE)
    w1p = jnp.zeros((obs, inner_p), jnp.float32).at[:, :inner].set(w1).astype(param_dtype)
    b1p = jnp.zeros((1, inner_p), jnp.float32).at[:, :inner].set(b1.reshape(1, -1))
    w2p = jnp.zeros((inner_p, act_p), jnp.float32).at[:inner, :act].set(w2).astype(param_dtype)
    b2p = jnp.zeros((1, act_p), jnp.float32).at[:, :act].set(b2.reshape(1, -1))
    return {"w1": w1p, "b1": b1p, "w2": w2p, "b2": b2p,
            "obs_size": obs, "act_size": act}


def _choose_tile(B, tile_b, small_batch):
    """Batch-tile rows. Small B -> one block (min latency). Large B -> at least
    2 grid steps (v7x megacore), capped at tile_b (VMEM budget)."""
    b8 = _round_up(B, 8)
    if b8 <= min(small_batch, tile_b):
        return b8
    half = _round_up((b8 + 1) // 2, 8)
    return max(8, min(tile_b, half))


def policy_forward(x, params, *, tile_b=4096, small_batch=1024):
    """x: any shape that flattens to (-1, obs_size); returns (B, act_size) f32."""
    obs = params["obs_size"]
    act = params["act_size"]
    w1p, b1p, w2p, b2p = params["w1"], params["b1"], params["w2"], params["b2"]
    inner_p = w1p.shape[1]
    act_p = w2p.shape[1]

    x2d = x.reshape(-1, obs).astype(w1p.dtype)        # mirrors x.view(-1, 7*7)
    B = x2d.shape[0]

    tb = _choose_tile(B, tile_b, small_batch)
    grid = (_cdiv(B, tb),)                            # ragged last block; no jnp.pad copy

    out = pl.pallas_call(
        policy_kernel,
        out_shape=jax.ShapeDtypeStruct((B, act), jnp.float32),
        grid_spec=pl.GridSpec(
            grid=grid,
            in_specs=[
                # batch-tiled activation stream
                pl.BlockSpec((tb, obs), lambda i: (i, 0)),
                # weights / biases: same block every step -> VMEM-resident
                pl.BlockSpec((obs, inner_p), lambda i: (0, 0)),
                pl.BlockSpec((1, inner_p), lambda i: (0, 0)),
                pl.BlockSpec((inner_p, act_p), lambda i: (0, 0)),
                pl.BlockSpec((1, act_p), lambda i: (0, 0)),
            ],
            # narrow output block: last dim equals the full array dim (act)
            out_specs=pl.BlockSpec((tb, act), lambda i: (i, 0)),
        ),
        compiler_params=pltpu.CompilerParams(
            # batch tiles are independent -> shard across v7x's 2 TensorCores
            dimension_semantics=("parallel",)),
    )(x2d, w1p, b1p, w2p, b2p)
    return out


def init_params(key, obs_size, inner_size, act_size):
    """Deterministic init matching nn.Linear's default U(-1/sqrt(fan_in), +1/sqrt(fan_in)).
    Weights stored as [in, out] (transposed vs. PyTorch's [out, in])."""
    k1, k2, k3, k4 = jax.random.split(key, 4)
    bound1 = 1.0 / jnp.sqrt(obs_size)
    bound2 = 1.0 / jnp.sqrt(inner_size)
    w1 = jax.random.uniform(k1, (obs_size, inner_size), jnp.float32, -bound1, bound1)
    b1 = jax.random.uniform(k2, (1, inner_size), jnp.float32, -bound1, bound1)
    w2 = jax.random.uniform(k3, (inner_size, act_size), jnp.float32, -bound2, bound2)
    b2 = jax.random.uniform(k4, (1, act_size), jnp.float32, -bound2, bound2)
    return w1, b1, w2, b2


def _reference(x, w1, b1, w2, b2):
    x2d = x.reshape(-1, w1.shape[0]).astype(jnp.float32)
    h = jnp.maximum(x2d @ w1 + b1, 0.0)
    return jnp.clip(h @ w2 + b2, -1000.0, 1000.0)


if __name__ == "__main__":
    OBS_SIZE = 7 * 7      # forward() hard-codes x.view(-1, 7*7)
    INNER_SIZE = 32
    ACT_SIZE = 4

    key = jax.random.PRNGKey(0)
    k_x, k_p = jax.random.split(key)

    w1, b1, w2, b2 = init_params(k_p, OBS_SIZE, INNER_SIZE, ACT_SIZE)
    params = prepare_params(w1, b1, w2, b2)            # padded once, outside per-call path

    # 1) Small batch: single full block, input shaped like raw obs (B, 7, 7).
    x = jax.random.normal(k_x, (8, 7, 7), dtype=jnp.float32)
    out = policy_forward(x, params)
    jax.block_until_ready(out)
    assert out.shape == (8, ACT_SIZE)
    assert jnp.allclose(out, _reference(x, w1, b1, w2, b2), atol=1e-5, rtol=1e-5)

    # 2) Odd small batch (B=5): single block bigger than the array; Pallas pads
    #    the OOB input rows and masks the OOB output rows.
    x5 = jax.random.normal(jax.random.PRNGKey(2), (5, 7, 7), dtype=jnp.float32)
    out5 = policy_forward(x5, params)
    jax.block_until_ready(out5)
    assert out5.shape == (5, ACT_SIZE)
    assert jnp.allclose(out5, _reference(x5, w1, b1, w2, b2), atol=1e-5, rtol=1e-5)

    # 3) Large batch: multi-tile grid with a ragged last block
    #    (3000 rows -> 3 tiles of 1024; last tile covers only 952 valid rows).
    xb = jax.random.normal(jax.random.PRNGKey(1), (3000, 7, 7), dtype=jnp.float32)
    outb = policy_forward(xb, params, tile_b=1024, small_batch=512)
    jax.block_until_ready(outb)
    assert outb.shape == (3000, ACT_SIZE)
    assert jnp.allclose(outb, _reference(xb, w1, b1, w2, b2), atol=1e-4, rtol=1e-4)

    # 4) Optional bf16 fast path: bf16 x/W on the MXU, f32 accumulation and
    #    f32 bias/ReLU/clamp.  No longer bit-matches the f32 reference, so the
    #    tolerance is relaxed.
    params_bf16 = prepare_params(w1, b1, w2, b2, param_dtype=jnp.bfloat16)
    outbf = policy_forward(xb, params_bf16, tile_b=1024, small_batch=512)
    jax.block_until_ready(outbf)
    assert outbf.shape == (3000, ACT_SIZE)
    assert jnp.allclose(outbf, _reference(xb, w1, b1, w2, b2), atol=5e-2, rtol=5e-2)

    print("KERNEL_OK")
</pallas_src>

<mosaic_0001>
module attributes {stable_mosaic.version = 11 : i64} {
  func.func @policy_kernel(%arg0: i32, %arg1: memref<8x49xf32, #tpu.memory_space<vmem>>, %arg2: memref<49x128xf32, #tpu.memory_space<vmem>>, %arg3: memref<1x128xf32, #tpu.memory_space<vmem>>, %arg4: memref<128x128xf32, #tpu.memory_space<vmem>>, %arg5: memref<1x128xf32, #tpu.memory_space<vmem>>, %arg6: memref<8x4xf32, #tpu.memory_space<vmem>>) attributes {dimension_semantics = [#tpu.dimension_semantics<parallel>], iteration_bounds = array<i64: 1>, scalar_prefetch = 0 : i64, scratch_operands = 0 : i64, tpu.core_type = #tpu.core_type<tc>, window_params = [{transform_indices = @transform_0, window_bounds = array<i64: 8, 49>}, {pipeline_mode = #tpu.pipeline_mode<synchronous>, transform_indices = @transform_1, window_bounds = array<i64: 49, 128>}, {pipeline_mode = #tpu.pipeline_mode<synchronous>, transform_indices = @transform_2, window_bounds = array<i64: 1, 128>}, {pipeline_mode = #tpu.pipeline_mode<synchronous>, transform_indices = @transform_3, window_bounds = array<i64: 128, 128>}, {pipeline_mode = #tpu.pipeline_mode<synchronous>, transform_indices = @transform_4, window_bounds = array<i64: 1, 128>}, {transform_indices = @transform_5, window_bounds = array<i64: 8, 4>}]} {
    %c0 = arith.constant 0 : index
    %c0_0 = arith.constant 0 : index
    %0 = vector.load %arg1[%c0, %c0_0] : memref<8x49xf32, #tpu.memory_space<vmem>>, vector<8x49xf32>
    %c0_1 = arith.constant 0 : index
    %c0_2 = arith.constant 0 : index
    %1 = vector.load %arg2[%c0_1, %c0_2] : memref<49x128xf32, #tpu.memory_space<vmem>>, vector<49x128xf32>
    %cst = arith.constant dense<0.000000e+00> : vector<8x128xf32>
    %2 = tpu.matmul %0, %1, %cst {dimension_numbers = #tpu.dot_dimension_numbers<[1], [0], [0], [1], [0, 0, 1, 1], [], []>} : vector<8x49xf32>, vector<49x128xf32>, vector<8x128xf32> -> vector<8x128xf32>
    %c0_3 = arith.constant 0 : index
    %c0_4 = arith.constant 0 : index
    %3 = vector.load %arg3[%c0_3, %c0_4] : memref<1x128xf32, #tpu.memory_space<vmem>>, vector<1x128xf32>
    %4 = vector.broadcast %3 : vector<1x128xf32> to vector<8x128xf32>
    %5 = arith.addf %2, %4 : vector<8x128xf32>
    %cst_5 = arith.constant 0.000000e+00 : f32
    %6 = vector.broadcast %cst_5 : f32 to vector<8x128xf32>
    %7 = arith.maximumf %5, %6 : vector<8x128xf32>
    %c0_6 = arith.constant 0 : index
    %c0_7 = arith.constant 0 : index
    %8 = vector.load %arg4[%c0_6, %c0_7] : memref<128x128xf32, #tpu.memory_space<vmem>>, vector<128x128xf32>
    %cst_8 = arith.constant dense<0.000000e+00> : vector<8x128xf32>
    %9 = tpu.matmul %7, %8, %cst_8 {dimension_numbers = #tpu.dot_dimension_numbers<[1], [0], [0], [1], [0, 0, 1, 1], [], []>} : vector<8x128xf32>, vector<128x128xf32>, vector<8x128xf32> -> vector<8x128xf32>
    %c0_9 = arith.constant 0 : index
    %c0_10 = arith.constant 0 : index
    %10 = vector.load %arg5[%c0_9, %c0_10] : memref<1x128xf32, #tpu.memory_space<vmem>>, vector<1x128xf32>
    %11 = vector.broadcast %10 : vector<1x128xf32> to vector<8x128xf32>
    %12 = arith.addf %9, %11 : vector<8x128xf32>
    %cst_11 = arith.constant -1.000000e+03 : f32
    %cst_12 = arith.constant 1.000000e+03 : f32
    %13 = vector.broadcast %cst_11 : f32 to vector<8x128xf32>
    %14 = arith.maximumf %13, %12 : vector<8x128xf32>
    %15 = vector.broadcast %cst_12 : f32 to vector<8x128xf32>
    %16 = arith.minimumf %15, %14 : vector<8x128xf32>
    %17 = vector.extract_strided_slice %16 {offsets = [0, 0], sizes = [8, 4], strides = [1, 1]} : vector<8x128xf32> to vector<8x4xf32>
    %c0_13 = arith.constant 0 : index
    %c0_14 = arith.constant 0 : index
    %18 = vector.load %arg6[%c0_13, %c0_14] : memref<8x4xf32, #tpu.memory_space<vmem>>, vector<8x4xf32>
    tpu.vector_store %arg6[%c0_13, %c0_14], %17 {strides = array<i32>} : memref<8x4xf32, #tpu.memory_space<vmem>>, vector<8x4xf32>,
    return
  }
  func.func @transform_0(%arg0: i32) -> (i32, i32) {
    %c0_i32 = arith.constant 0 : i32
    %c0_i32_0 = arith.constant 0 : i32
    return %arg0, %c0_i32 : i32, i32
  }
  func.func @transform_1(%arg0: i32) -> (i32, i32) {
    %c0_i32 = arith.constant 0 : i32
    %c0_i32_0 = arith.constant 0 : i32
    %c0_i32_1 = arith.constant 0 : i32
    return %c0_i32, %c0_i32_0 : i32, i32
  }
  func.func @transform_2(%arg0: i32) -> (i32, i32) {
    %c0_i32 = arith.constant 0 : i32
    %c0_i32_0 = arith.constant 0 : i32
    %c0_i32_1 = arith.constant 0 : i32
    return %c0_i32, %c0_i32_0 : i32, i32
  }
  func.func @transform_3(%arg0: i32) -> (i32, i32) {
    %c0_i32 = arith.constant 0 : i32
    %c0_i32_0 = arith.constant 0 : i32
    %c0_i32_1 = arith.constant 0 : i32
    return %c0_i32, %c0_i32_0 : i32, i32
  }
  func.func @transform_4(%arg0: i32) -> (i32, i32) {
    %c0_i32 = arith.constant 0 : i32
    %c0_i32_0 = arith.constant 0 : i32
    %c0_i32_1 = arith.constant 0 : i32
    return %c0_i32, %c0_i32_0 : i32, i32
  }
  func.func @transform_5(%arg0: i32) -> (i32, i32) {
    %c0_i32 = arith.constant 0 : i32
    %c0_i32_0 = arith.constant 0 : i32
    return %arg0, %c0_i32 : i32, i32
  }
}

</mosaic_0001>

<bundles_post_ra>
// kernel: tpu_custom_call.1
= control target key start
LH: loop header
LB: loop body
LE: loop exit
PB: predicated region body
PF: predicated region fallthrough
CT: control target
= control target key end

     0   :  { %10 = vsyncpa [#allocation3], 0  ;;  %s538_s0 = inlined_call_operand.hbm [shape: f32[8,49], index: 0, kind: input, shape index: {}]   ;;  %s539_s1 = inlined_call_operand.hbm [shape: f32[49,128], index: 1, kind: input, shape index: {}]   ;;  %s540_s2 = inlined_call_operand.vmem [shape: f32[1,128], index: 2, kind: input, shape index: {}]   ;;  %s541_s3 = inlined_call_operand.hbm [shape: f32[128,128], index: 3, kind: input, shape index: {}]   ;;  %s542_s4 = inlined_call_operand.vmem [shape: f32[1,128], index: 4, kind: input, shape index: {}]   ;;  %s543_s5 = inlined_call_operand.vmem [shape: f32[8,4], index: 5, kind: output, shape index: {}]  }
   0x1   :  { %11 = vsyncpa [#allocation5], 0  ;;  %s449_s18 = smov [#allocation4]   ;;  %s379_s22 = scalar_lea.hbm %s539_s1, 896 }
   0x2   :  { %s27_s19 = sshll.u32 %s449_s18, 4  ;;  %p380_p0 = scmp.ne.s32.totalorder %s539_s1, %s379_s22  ;;  %s28_s19 = int_to_ptr.vmem [resolvable:$true] %s27_s19 }
   0x3   :  { %p383_p1 = scmp.lt.u32.totalorder %s379_s22, %s539_s1 }
   0x5   :  { %p385_p2 = pnand %p383_p1, %p380_p0 }
   0x7   :  { %388 = shalt.err (!%p385_p2)
}
   0x8   :  { %s389_s27 = scalar_lea.vmem %s28_s19, 896  ;;  %p394_p4 = scmp.lt.s32.totalorder %s28_s19, %s28_s19 }
   0x9   :  { %p390_p3 = scmp.ne.s32.totalorder %s28_s19, %s389_s27  ;;  %p395_p5 = scmp.lt.s32.totalorder %s389_s27, %s389_s27 }
   0xb   :  { %p396_p6 = por %p395_p5, %p394_p4 }
   0xd   :  { %p397_p7 = pnand %p396_p6, %p390_p3 }
   0xf   :  { %400 = shalt.err (!%p397_p7)
}
  0x10   :  { %s450_s28 = smov 128   ;;  %s451_s29 = smov 8  }
  0x11   :  { %33 = dma.hbm_to_vmem [thread:$0]  %s539_s1, 896, %s28_s19, [#allocation5], %s450_s28, %s450_s28, %s451_s29  }
  0x12   :  { %s452_s7 = smov [#allocation2]   ;;  %s453_s9 = smov [#allocation6]  }
  0x13   :  { %s18_s8 = sshll.u32 %s452_s7, 4  ;;  %s41_s10 = sshll.u32 %s453_s9, 4  ;;  %s19_s8 = int_to_ptr.vmem [resolvable:$true] %s18_s8  ;;  %s42_s10 = int_to_ptr.vmem [resolvable:$true] %s41_s10 }
  0x14   :  { %s401_s13 = scalar_lea.hbm %s538_s0, 128 }
  0x15   :  { %p402_p8 = scmp.ne.s32.totalorder %s538_s0, %s401_s13  ;;  %p405_p9 = scmp.lt.u32.totalorder %s401_s13, %s538_s0 }
  0x17   :  { %p407_p10 = pnand %p405_p9, %p402_p8 }
  0x19   :  { %410 = shalt.err (!%p407_p10)
}
  0x1a   :  { %s411_s1 = scalar_lea.vmem %s19_s8, 128  ;;  %p416_p12 = scmp.lt.s32.totalorder %s19_s8, %s19_s8 }
  0x1b   :  { %p412_p11 = scmp.ne.s32.totalorder %s19_s8, %s411_s1  ;;  %p417_p13 = scmp.lt.s32.totalorder %s411_s1, %s411_s1 }
  0x1d   :  { %p418_p0 = por %p417_p13, %p416_p12 }
  0x1f   :  { %p419_p1 = pnand %p418_p0, %p412_p11 }
  0x21   :  { %422 = shalt.err (!%p419_p1)
}
  0x22   :  { %21 = dma.hbm_to_vmem [thread:$0]  %s538_s0, 128, %s19_s8, [#allocation3]  }
  0x23   :  { %s423_s22 = scalar_lea.hbm %s541_s3, 2048 }
  0x24   :  { %p424_p2 = scmp.ne.s32.totalorder %s541_s3, %s423_s22  ;;  %p427_p3 = scmp.lt.u32.totalorder %s423_s22, %s541_s3 }
  0x26   :  { %p429_p4 = pnand %p427_p3, %p424_p2 }
  0x28   :  { %432 = shalt.err (!%p429_p4)
}
  0x29   :  { %s433_s27 = scalar_lea.vmem %s42_s10, 2048  ;;  %p438_p6 = scmp.lt.s32.totalorder %s42_s10, %s42_s10 }
  0x2a   :  { %p434_p5 = scmp.ne.s32.totalorder %s42_s10, %s433_s27  ;;  %p439_p7 = scmp.lt.s32.totalorder %s433_s27, %s433_s27 }
  0x2c   :  { %p440_p8 = por %p439_p7, %p438_p6 }
  0x2e   :  { %p441_p9 = pnand %p440_p8, %p434_p5 }
  0x30   :  { %444 = shalt.err (!%p441_p9)
}
  0x31   :  { %47 = dma.hbm_to_vmem [thread:$0]  %s541_s3, 2048, %s42_s10, [#allocation5], %s450_s28, %s450_s28, %s451_s29  }
  0x32   :  { %445 = dma.done.wait [#allocation3], 128  }
  0x33   :  { %446 = vsyncadd [#allocation3], 4294967168 }
  0x34   :  { %447 = dma.done.wait [#allocation5], 2944  }
  0x35   :  { %448 = vsyncadd [#allocation5], 4294964352  ;;  %v454_v0 = vmov 0.0|0.0   ;;  %vm455_vm0 = vmmov 0   ;;  %v456_v1 = vmov 0.0   ;;  %v60_v2 = vld [vmem:[#allocation4] sm:$0xff] }
  0x36   :  { %338 = vmatprep.subr.bf16.mxu0 %v454_v0  ;;  %300 = vmatprep.mubr.msk.f32.mxu0 %vm455_vm0, %v456_v1  ;;  %v61_v3 = vld [vmem:[#allocation4 + $0x8] sm:$0xff]  ;;  %v62_v4 = vld [vmem:[#allocation4 + $0x10] sm:$0xff]  ;;  %v63_v6 = vld [vmem:[#allocation4 + $0x18] sm:$0xff]  ;;  %vm78_vm1 = vcmask 1040384   ;;  %vm74_vm2 = vcmask 400384   ;;  %vm248_vm3 = vcmask 31744  }
  0x37   :  { %347 = vmatprep.subr.bf16.mxu1 %v454_v0  ;;  %335 = vmatprep.mubr.msk.f32.mxu1 %vm455_vm0, %v456_v1  ;;  %v339_v5 = vpack.c.bf16 %v61_v3, %v60_v2  ;;  %v153_v7 = vld [vmem:[#allocation6] sm:$0xff]  ;;  %v342_v8 = vpack.c.bf16 %v63_v6, %v62_v4  ;;  %v154_v9 = vld [vmem:[#allocation6 + $0x8] sm:$0xff]  ;;  %v155_v10 = vld [vmem:[#allocation6 + $0x10] sm:$0xff] }
  0x38   :  { %v156_v11 = vld [vmem:[#allocation6 + $0x18] sm:$0xff]  ;;  %v64_v12 = vld [vmem:[#allocation4 + $0x20] sm:$0xff]  ;;  %v65_v13 = vld [vmem:[#allocation4 + $0x28] sm:$0xff]  ;;  %v348_v14 = vpack.c.bf16 %v154_v9, %v153_v7 }
  0x39   :  { %340 = vmatpush3.bf16.msra.mxu0 %v339_v5  ;;  %v351_v15 = vpack.c.bf16 %v156_v11, %v155_v10  ;;  %v345_v16 = vpack.c.bf16 %v65_v13, %v64_v12  ;;  %v157_v17 = vld [vmem:[#allocation6 + $0x20] sm:$0xff]  ;;  %v158_v18 = vld [vmem:[#allocation6 + $0x28] sm:$0xff]  ;;  %v159_v20 = vld [vmem:[#allocation6 + $0x30] sm:$0xff] }
  0x3a   :  { %341 = vmatprep.subr.bf16.mxu0 %v454_v0  ;;  %349 = vmatpush3.bf16.msra.mxu1 %v348_v14  ;;  %v354_v19 = vpack.c.bf16 %v158_v18, %v157_v17  ;;  %v160_v21 = vld [vmem:[#allocation6 + $0x38] sm:$0xff]  ;;  %v59_v23 = vld [vmem:[#allocation2] sm:$0xff]  ;;  %v162_v26 = vld [vmem:[#allocation6 + $0x48] sm:$0xff] }
  0x3b   :  { %350 = vmatprep.subr.bf16.mxu1 %v454_v0  ;;  %v66_v22 = vld [vmem:[#allocation4 + $0x30] sm:$0x1]  ;;  %v357_v24 = vpack.c.bf16 %v160_v21, %v159_v20  ;;  %v161_v25 = vld [vmem:[#allocation6 + $0x40] sm:$0xff]  ;;  %v163_v28 = vld [vmem:[#allocation6 + $0x50] sm:$0xff] }
  0x3c   :  { %v360_v27 = vpack.c.bf16 %v162_v26, %v161_v25  ;;  %v164_v29 = vld [vmem:[#allocation6 + $0x58] sm:$0xff]  ;;  %v165_v31 = vld [vmem:[#allocation6 + $0x60] sm:$0xff]  ;;  %v166_v32 = vld [vmem:[#allocation6 + $0x68] sm:$0xff] }
  0x3d   :  { %343 = vmatpush3.bf16.msra.mxu0 %v342_v8  ;;  %v363_v30 = vpack.c.bf16 %v164_v29, %v163_v28  ;;  %v366_v33 = vpack.c.bf16 %v166_v32, %v165_v31  ;;  %v167_v34 = vld [vmem:[#allocation6 + $0x70] sm:$0xff]  ;;  %v168_v35 = vld [vmem:[#allocation6 + $0x78] sm:$0xff]  ;;  %v256_v37 = vld [vmem:[%s540_s2] ss:$0 sm:$0xff] }
  0x3e   :  { %344 = vmatprep.subr.bf16.mxu0 %v454_v0  ;;  %352 = vmatpush3.bf16.msra.mxu1 %v351_v15  ;;  %v369_v36 = vpack.c.bf16 %v168_v35, %v167_v34  ;;  %v259_v42 = vld [vmem:[%s542_s4] ss:$0 sm:$0xff] }
  0x3f   :  { %353 = vmatprep.subr.bf16.mxu1 %v454_v0 }
  0x41   :  { %346 = vmatpush3.bf16.msra.mxu0 %v345_v16 }
  0x42   :  { %298 = vmatprep.subr.mxu0 %v456_v1  ;;  %355 = vmatpush3.bf16.msra.mxu1 %v354_v19 }
  0x43   :  { %356 = vmatprep.subr.bf16.mxu1 %v454_v0 }
  0x45   :  { %299 = vmatpush3.msk.msra.mxu0 %vm78_vm1, %v66_v22 }
  0x46   :  { %301 = vmatmul.mubr.msk.f32.vlgmr.msra.gmra.mrb[0].mxu0 %vm74_vm2, %v59_v23  ;;  %358 = vmatpush3.bf16.msra.mxu1 %v357_v24 }
  0x47   :  { %359 = vmatprep.subr.bf16.mxu1 %v454_v0 }
  0x4a   :  { %361 = vmatpush3.bf16.msra.mxu1 %v360_v27 }
  0x4b   :  { %362 = vmatprep.subr.bf16.mxu1 %v454_v0 }
  0x4e   :  { %364 = vmatpush3.bf16.msra.mxu1 %v363_v30 }
  0x4f   :  { %365 = vmatprep.subr.bf16.mxu1 %v454_v0 }
  0x52   :  { %367 = vmatpush3.bf16.msra.mxu1 %v366_v33 }
  0x53   :  { %368 = vmatprep.subr.bf16.mxu1 %v454_v0 }
  0x56   :  { %370 = vmatpush3.bf16.msra.mxu1 %v369_v36 }
 0x119   :  { %v148_v38 = vpop.f32.mrb[0].mxu0 }
 0x11a   :  { %v149_v39 = vadd.f32 %v256_v37, %v148_v38  ;;  %v302_v40 = vpop.f32.mrb[1].mxu0 }
 0x11c   :  { %v152_v41 = vmax.f32 %v149_v39, 0.0 }
 0x11e   :  { %336 = vmatmul.mubr.f32.vlgmr.msra.gmra.mrb[0].mxu1 %v152_v41 }
 0x1f1   :  { %v242_v43 = vpop.f32.mrb[0].mxu1 }
 0x1f2   :  { %v243_v44 = vadd.f32 %v259_v42, %v242_v43  ;;  %v337_v45 = vpop.f32.mrb[1].mxu1 }
 0x1f4   :  { %v260_v46 = vclamps-f32 %v243_v44, 1000.0 }
 0x1f6   :  { %249 = vst.msk [vmem:[%s543_s5] sm:$0xff] %vm248_vm3, %v260_v46 }
 0x1f7   :  { %254 = vsyncpa [#allocation3], 1 }
 0x1f8   :  { %255 = vsyncpa [#allocation5], 1 }

</bundles_post_ra>
